<compile_context>
chip_gen: v6e
topology: v6e:2x2x1
jax: 0.10.0
libtpu: 0.0.40
codegen_flags: <defaults>
</compile_context>

<pallas_src>
import jax
import jax.numpy as jnp
from jax.experimental import pallas as pl
from jax.experimental.pallas import tpu as pltpu

# Deterministic parameter init (same values as Rational.reset_parameters).
# Column 0 = numerator P coefficients for [x^3, x^2, x, 1],
# Column 1 = denominator Q coefficients for [x^3, x^2, x, 1].
COEFFS = jnp.array(
    [[1.1915, 0.0],
     [1.5957, 2.383],
     [0.5,    0.0],
     [0.0218, 1.0]],
    dtype=jnp.float32,
)

_LANE = 128  # lane width of a vreg


def _rational_kernel(coeffs_ref, x_ref, o_ref):
    # coeffs_ref: (4, 2) f32 in SMEM; x_ref / o_ref: (block_rows, 128) in VMEM.
    # bf16 inputs run the Horner chains in bf16 (bf16 VALUs on v6e/v7x halve vreg
    # traffic); everything else computes in f32.  The reciprocal uses the EUP (its own
    # bundle slot) with one Newton refinement for ~f32 accuracy.
    compute_dtype = jnp.bfloat16 if x_ref.dtype == jnp.bfloat16 else jnp.float32
    x = x_ref[...].astype(compute_dtype)

    c = [[coeffs_ref[i, j].astype(compute_dtype) for j in (0, 1)] for i in range(4)]

    # Horner evaluation; coefficient rows are ordered [x^3, x^2, x, 1]
    # (matches X = [x^3, x^2, x, 1] @ coeffs in the PyTorch forward).
    p = ((c[0][0] * x + c[1][0]) * x + c[2][0]) * x + c[3][0]
    # forward() zeroes coeffs[0, 1] before evaluating, so Q is exactly degree 2.
    q = (c[1][1] * x + c[2][1]) * x + c[3][1]

    qf = q.astype(jnp.float32)
    r = pl.reciprocal(qf, approx=True)      # EUP seed
    r = r * (2.0 - qf * r)                  # one Newton step -> ~f32 precision
    o_ref[...] = (p.astype(jnp.float32) * r).astype(o_ref.dtype)


def _round_up(x: int, m: int) -> int:
    return ((x + m - 1) // m) * m


def rational(x: jax.Array, coeffs: jax.Array = COEFFS, *, block_rows: int = 1024) -> jax.Array:
    """Elementwise rational activation; works for any input shape/dtype."""
    orig_shape = x.shape
    orig_dtype = x.dtype

    n = x.size
    if n == 0:
        return x

    # forward() zeroes the x^3 coefficient of Q before evaluating; keep coeffs as an
    # SMEM operand (trainable-coeffs variant) instead of baking constants into the kernel.
    coeffs = coeffs.astype(jnp.float32).at[0, 1].set(0.0)

    # Sublane granularity: 8 rows for 4-byte dtypes, 16 for 2-byte, 32 for 1-byte.
    itemsize = jnp.dtype(orig_dtype).itemsize
    sub = 8 * max(1, 4 // itemsize)
    tile_elems = sub * _LANE

    # Lane-dense [rows, 128] slab.  Fast path: no pad and no trailing slice when the
    # element count is already tile-aligned (the common case for NCHW activations) --
    # avoids two extra full-tensor HBM passes in the wrapper.
    flat = x.reshape(-1)
    pad = (-n) % tile_elems
    if pad:
        flat = jnp.pad(flat, (0, pad), constant_values=1)  # Q(1) = 3.383 != 0, safe filler
    rows = flat.shape[0] // _LANE
    x2d = flat.reshape(rows, _LANE)

    # Big tiles amortize grid-step overhead; when there is enough work, force >= 2 grid
    # steps so the "parallel" axis can shard across both TensorCores on v7x.
    br = min(block_rows, rows)
    if rows > 2 * sub:
        br = min(br, _round_up(pl.cdiv(rows, 2), sub))
    br = max(sub, _round_up(br, sub))
    grid = (pl.cdiv(rows, br),)

    out2d = pl.pallas_call(
        _rational_kernel,
        out_shape=jax.ShapeDtypeStruct((rows, _LANE), orig_dtype),
        grid_spec=pltpu.PrefetchScalarGridSpec(
            num_scalar_prefetch=0,
            grid=grid,
            in_specs=[
                pl.BlockSpec(memory_space=pltpu.SMEM),        # coeffs (4, 2), untiled
                pl.BlockSpec((br, _LANE), lambda i: (i, 0)),  # input tile
            ],
            out_specs=pl.BlockSpec((br, _LANE), lambda i: (i, 0)),
        ),
        compiler_params=pltpu.CompilerParams(
            dimension_semantics=("parallel",),
        ),
    )(coeffs, x2d)

    if pad:
        return out2d.reshape(-1)[:n].reshape(orig_shape)
    return out2d.reshape(orig_shape)


def _rational_ref(x, coeffs=COEFFS):
    """Pure-JAX reference mirroring the PyTorch forward exactly."""
    coeffs = coeffs.astype(x.dtype).at[0, 1].set(0.0)
    exp = jnp.array([3.0, 2.0, 1.0, 0.0], dtype=x.dtype)
    X = jnp.power(x[..., None], exp)                 # (..., 4)
    PQ = X @ coeffs                                  # (..., 2)
    return PQ[..., 0] / PQ[..., 1]


if __name__ == "__main__":
    key = jax.random.PRNGKey(0)
    x = jax.random.normal(key, (2, 4, 16, 16), dtype=jnp.float32)  # NCHW

    out = rational(x)
    jax.block_until_ready(out)

    ref = _rational_ref(x)
    assert out.shape == x.shape and out.dtype == x.dtype
    # approx-reciprocal + one Newton step -> a few-ulp relative error vs exact divide
    assert jnp.allclose(out, ref, atol=1e-4, rtol=1e-4), "mismatch vs reference"

    # Also exercise the unaligned / padded path once for coverage.
    x_odd = jax.random.normal(jax.random.PRNGKey(1), (3, 5, 7), dtype=jnp.float32)
    out_odd = rational(x_odd)
    jax.block_until_ready(out_odd)
    assert jnp.allclose(out_odd, _rational_ref(x_odd), atol=1e-4, rtol=1e-4)

    print("KERNEL_OK")
</pallas_src>

<mosaic_0001>
module attributes {stable_mosaic.version = 11 : i64} {
  func.func @_rational_kernel(%arg0: i32, %arg1: memref<4x2xf32, #tpu.memory_space<smem>>, %arg2: memref<16x128xf32, #tpu.memory_space<vmem>>, %arg3: memref<16x128xf32, #tpu.memory_space<vmem>>) attributes {dimension_semantics = [#tpu.dimension_semantics<parallel>], iteration_bounds = array<i64: 1>, scalar_prefetch = 0 : i64, scratch_operands = 0 : i64, tpu.core_type = #tpu.core_type<tc>, window_params = [{transform_indices = @transform_0, window_bounds = array<i64: 4, 2>}, {transform_indices = @transform_1, window_bounds = array<i64: 16, 128>}, {transform_indices = @transform_2, window_bounds = array<i64: 16, 128>}]} {
    %c0 = arith.constant 0 : index
    %c0_0 = arith.constant 0 : index
    %0 = vector.load %arg2[%c0, %c0_0] : memref<16x128xf32, #tpu.memory_space<vmem>>, vector<16x128xf32>
    %c0_1 = arith.constant 0 : index
    %c0_2 = arith.constant 0 : index
    %1 = memref.load %arg1[%c0_1, %c0_2] : memref<4x2xf32, #tpu.memory_space<smem>>
    %c1 = arith.constant 1 : index
    %c0_3 = arith.constant 0 : index
    %2 = memref.load %arg1[%c1, %c0_3] : memref<4x2xf32, #tpu.memory_space<smem>>
    %c1_4 = arith.constant 1 : index
    %c1_5 = arith.constant 1 : index
    %3 = memref.load %arg1[%c1_4, %c1_5] : memref<4x2xf32, #tpu.memory_space<smem>>
    %c2 = arith.constant 2 : index
    %c0_6 = arith.constant 0 : index
    %4 = memref.load %arg1[%c2, %c0_6] : memref<4x2xf32, #tpu.memory_space<smem>>
    %c2_7 = arith.constant 2 : index
    %c1_8 = arith.constant 1 : index
    %5 = memref.load %arg1[%c2_7, %c1_8] : memref<4x2xf32, #tpu.memory_space<smem>>
    %c3 = arith.constant 3 : index
    %c0_9 = arith.constant 0 : index
    %6 = memref.load %arg1[%c3, %c0_9] : memref<4x2xf32, #tpu.memory_space<smem>>
    %c3_10 = arith.constant 3 : index
    %c1_11 = arith.constant 1 : index
    %7 = memref.load %arg1[%c3_10, %c1_11] : memref<4x2xf32, #tpu.memory_space<smem>>
    %8 = vector.broadcast %1 : f32 to vector<16x128xf32>
    %9 = arith.mulf %8, %0 : vector<16x128xf32>
    %10 = vector.broadcast %2 : f32 to vector<16x128xf32>
    %11 = arith.addf %9, %10 : vector<16x128xf32>
    %12 = arith.mulf %11, %0 : vector<16x128xf32>
    %13 = vector.broadcast %4 : f32 to vector<16x128xf32>
    %14 = arith.addf %12, %13 : vector<16x128xf32>
    %15 = arith.mulf %14, %0 : vector<16x128xf32>
    %16 = vector.broadcast %6 : f32 to vector<16x128xf32>
    %17 = arith.addf %15, %16 : vector<16x128xf32>
    %18 = vector.broadcast %3 : f32 to vector<16x128xf32>
    %19 = arith.mulf %18, %0 : vector<16x128xf32>
    %20 = vector.broadcast %5 : f32 to vector<16x128xf32>
    %21 = arith.addf %19, %20 : vector<16x128xf32>
    %22 = arith.mulf %21, %0 : vector<16x128xf32>
    %23 = vector.broadcast %7 : f32 to vector<16x128xf32>
    %24 = arith.addf %22, %23 : vector<16x128xf32>
    %25 = tpu.reciprocal %24 {approx = true} : vector<16x128xf32> -> vector<16x128xf32>
    %26 = arith.mulf %24, %25 : vector<16x128xf32>
    %cst = arith.constant 2.000000e+00 : f32
    %27 = vector.broadcast %cst : f32 to vector<16x128xf32>
    %28 = arith.subf %27, %26 : vector<16x128xf32>
    %29 = arith.mulf %25, %28 : vector<16x128xf32>
    %30 = arith.mulf %17, %29 : vector<16x128xf32>
    %c0_12 = arith.constant 0 : index
    %c0_13 = arith.constant 0 : index
    %31 = vector.load %arg3[%c0_12, %c0_13] : memref<16x128xf32, #tpu.memory_space<vmem>>, vector<16x128xf32>
    tpu.vector_store %arg3[%c0_12, %c0_13], %30 {strides = array<i32>} : memref<16x128xf32, #tpu.memory_space<vmem>>, vector<16x128xf32>,
    return
  }
  func.func @transform_0(%arg0: i32) -> (i32, i32) {
    %c0_i32 = arith.constant 0 : i32
    %c0_i32_0 = arith.constant 0 : i32
    %c0_i32_1 = arith.constant 0 : i32
    return %c0_i32, %c0_i32_0 : i32, i32
  }
  func.func @transform_1(%arg0: i32) -> (i32, i32) {
    %c0_i32 = arith.constant 0 : i32
    %c0_i32_0 = arith.constant 0 : i32
    return %arg0, %c0_i32 : i32, i32
  }
  func.func @transform_2(%arg0: i32) -> (i32, i32) {
    %c0_i32 = arith.constant 0 : i32
    %c0_i32_0 = arith.constant 0 : i32
    return %arg0, %c0_i32 : i32, i32
  }
}

</mosaic_0001>

<bundles_post_ra>
// kernel: tpu_custom_call.1
= control target key start
LH: loop header
LB: loop body
LE: loop exit
PB: predicated region body
PF: predicated region fallthrough
CT: control target
= control target key end

     0   :  { %7 = vsyncpa [#allocation5], 0  ;;  %s213_s0 = inlined_call_operand.vmem [shape: f32[4,2], index: 0, kind: input, shape index: {}]   ;;  %s214_s1 = inlined_call_operand.hbm [shape: f32[16,128], index: 1, kind: input, shape index: {}]   ;;  %s215_s2 = inlined_call_operand.hbm [shape: f32[16,128], index: 2, kind: output, shape index: {}]  }
   0x1   :  { %8 = vsyncpa [#allocation3], 0 }
   0x2   :  { %9 = vsyncpa [#allocation4], 0  ;;  %s16_s11 = sshll.u32 %s213_s0, 4  ;;  %s17_s11 = int_to_ptr.vmem [resolvable:$true] %s16_s11 }
   0x3   :  { %s120_s12 = scalar_lea.vmem %s17_s11, 64  ;;  %p125_p1 = scmp.lt.s32.totalorder %s17_s11, %s17_s11 }
   0x4   :  { %p121_p0 = scmp.ne.s32.totalorder %s17_s11, %s120_s12  ;;  %p126_p2 = scmp.lt.s32.totalorder %s120_s12, %s120_s12 }
   0x6   :  { %p127_p3 = por %p126_p2, %p125_p1 }
   0x8   :  { %p128_p4 = pnand %p127_p3, %p121_p0 }
   0xa   :  { %131 = shalt.err (!%p128_p4)
}
   0xb   :  { %s178_s13 = smov [#allocation2]   ;;  %s179_s14 = smov [#allocation6]  }
   0xc   :  { %19 = dma.vmem_to_smem %s17_s11, 64, %s178_s13, [#allocation5]  }
   0xd   :  { %s25_s15 = sshll.u32 %s179_s14, 4  ;;  %s26_s15 = int_to_ptr.vmem [resolvable:$true] %s25_s15 }
   0xe   :  { %s140_s16 = scalar_lea.vmem %s26_s15, 256  ;;  %p145_p6 = scmp.lt.s32.totalorder %s26_s15, %s26_s15 }
   0xf   :  { %p141_p5 = scmp.ne.s32.totalorder %s26_s15, %s140_s16  ;;  %p146_p7 = scmp.lt.s32.totalorder %s140_s16, %s140_s16 }
  0x11   :  { %p147_p8 = por %p146_p7, %p145_p6 }
  0x13   :  { %p148_p9 = pnand %p147_p8, %p141_p5 }
  0x15   :  { %151 = shalt.err (!%p148_p9)
}
  0x16   :  { %s180_s0 = smov 128   ;;  %s181_s17 = smov 8  }
  0x17   :  { %31 = dma.hbm_to_vmem [thread:$0]  %s214_s1, 256, %s26_s15, [#allocation3], %s180_s0, %s180_s0, %s181_s17  }
  0x18   :  { %172 = dma.done.wait [#allocation5], 64  }
  0x19   :  { %173 = vsyncadd [#allocation5], 4294967232 }
  0x1a   :  { %174 = dma.done.wait [#allocation3], 256  }
  0x1b   :  { %175 = vsyncadd [#allocation3], 4294967040 }
  0x1c   :  { %38 = sfence }
  0x1d   :  { %s41_s20 = sld [smem:[#allocation2]]  ;;  %v39_v0 = vld [vmem:[#allocation6] sm:$0xff]  ;;  %v40_v1 = vld [vmem:[#allocation6 + $0x8] sm:$0xff]  ;;  %s182_s26 = smov [#allocation7]  }
  0x1e   :  { %s106_s21 = sld [smem:[#allocation2 + $0x81]]  ;;  %s92_s27 = sshll.u32 %s182_s26, 4  ;;  %s93_s27 = int_to_ptr.vmem [resolvable:$true] %s92_s27 }
  0x1f   :  { %s108_s22 = sld [smem:[#allocation2 + $0x101]]  ;;  %s152_s28 = scalar_lea.vmem %s93_s27, 256 }
  0x20   :  { %s105_s23 = sld [smem:[#allocation2 + $0x80]]  ;;  %p153_p10 = scmp.ne.s32.totalorder %s93_s27, %s152_s28 }
  0x21   :  { %s110_s24 = sld [smem:[#allocation2 + $0x181]]  ;;  %p157_p11 = scmp.lt.s32.totalorder %s93_s27, %s93_s27 }
  0x22   :  { %s107_s1 = sld [smem:[#allocation2 + $0x100]]  ;;  %p158_p12 = scmp.lt.s32.totalorder %s152_s28, %s152_s28 }
  0x23   :  { %v48_v4 = vstv %s41_s20  ;;  %s109_s25 = sld [smem:[#allocation2 + $0x180]] }
  0x24   :  { %v64_v2 = vstv %s106_s21  ;;  %v49_v10 = vmul.f32 %v48_v4, %v39_v0  ;;  %v50_v13 = vmul.f32 %v48_v4, %v40_v1  ;;  %p159_p13 = por %p158_p12, %p157_p11 }
  0x25   :  { %v65_v3 = vmul.f32 %v64_v2, %v39_v0  ;;  %v67_v5 = vstv %s108_s22  ;;  %v66_v6 = vmul.f32 %v64_v2, %v40_v1 }
  0x26   :  { %v51_v12 = vstv %s105_s23  ;;  %p160_p0 = pnand %p159_p13, %p153_p10 }
  0x27   :  { %v68_v7 = vadd.f32 %v67_v5, %v65_v3  ;;  %v72_v8 = vstv %s110_s24  ;;  %v69_v9 = vadd.f32 %v67_v5, %v66_v6  ;;  %v52_v17 = vadd.f32 %v51_v12, %v49_v10 }
  0x28   :  { %v53_v18 = vadd.f32 %v51_v12, %v50_v13  ;;  %v56_v20 = vstv %s107_s1 }
  0x29   :  { %v70_v11 = vmul.f32 %v68_v7, %v39_v0  ;;  %v71_v14 = vmul.f32 %v69_v9, %v40_v1  ;;  %v54_v19 = vmul.f32 %v52_v17, %v39_v0  ;;  %v61_v26 = vstv %s109_s25 }
  0x2a   :  { %v55_v21 = vmul.f32 %v53_v18, %v40_v1 }
  0x2b   :  { %v73_v15 = vadd.f32 %v72_v8, %v70_v11  ;;  %v74_v16 = vadd.f32 %v72_v8, %v71_v14  ;;  %v57_v22 = vadd.f32 %v56_v20, %v54_v19 }
  0x2c   :  { %v58_v23 = vadd.f32 %v56_v20, %v55_v21 }
  0x2d   :  { %116 = vrcp.f32 %v73_v15  ;;  %v59_v24 = vmul.f32 %v57_v22, %v39_v0 }
  0x2e   :  { %118 = vrcp.f32 %v74_v16  ;;  %v60_v27 = vmul.f32 %v58_v23, %v40_v1 }
  0x2f   :  { %v62_v31 = vadd.f32 %v61_v26, %v59_v24 }
  0x30   :  { %v63_v33 = vadd.f32 %v61_v26, %v60_v27 }
  0x3a   :  { %v117_v25 = vpop.eup %116 }
  0x3b   :  { %v119_v28 = vpop.eup %118  ;;  %v77_v29 = vmul.f32 %v117_v25, %v73_v15 }
  0x3c   :  { %v78_v30 = vmul.f32 %v119_v28, %v74_v16 }
  0x3d   :  { %v79_v32 = vsub.f32 2.0, %v77_v29 }
  0x3e   :  { %v80_v34 = vsub.f32 2.0, %v78_v30 }
  0x3f   :  { %v81_v35 = vmul.f32 %v117_v25, %v79_v32 }
  0x40   :  { %v82_v36 = vmul.f32 %v119_v28, %v80_v34 }
  0x41   :  { %v83_v37 = vmul.f32 %v81_v35, %v62_v31 }
  0x42   :  { %v84_v38 = vmul.f32 %v82_v36, %v63_v33 }
  0x43   :  { %85 = vst [vmem:[#allocation7] sm:$0xff] %v83_v37 }
  0x44   :  { %86 = vst [vmem:[#allocation7 + $0x8] sm:$0xff] %v84_v38 }
  0x45   :  { %163 = shalt.err (!%p160_p0)
}
  0x46   :  { %98 = dma.vmem_to_hbm [thread:$0]  %s93_s27, 256, %s215_s2, [#allocation4], %s180_s0, %s180_s0, %s181_s17  }
  0x47   :  { %176 = dma.done.wait [#allocation4], 256  }
  0x48   :  { %177 = vsyncadd [#allocation4], 4294967040 }
  0x49   :  { %102 = vsyncpa [#allocation3], 1 }
  0x4a   :  { %103 = vsyncpa [#allocation4], 1 }
  0x4b   :  { %104 = vsyncpa [#allocation5], 1 }

</bundles_post_ra>
